<compile_context>
chip_gen: v5e
topology: v5e:2x2
jax: 0.10.0
libtpu: 0.0.40
codegen_flags: <defaults>
</compile_context>

<pallas_src>
import jax
import jax.numpy as jnp
from jax.experimental import pallas as pl
from jax.experimental.pallas import tpu as pltpu

_MASK_BIAS = -1e30   # additive mask bias (finite, so no NaN from -inf arithmetic)


def _attention_kernel(inp_ref, src_ref, bias_ref, w_in_ref, w_out_ctx_ref,
                      w_out_inp_ref, out_ref, attn_ref):
    # Per-grid-step shapes (tb = batch tile):
    #   inp_ref       : (tb, Din)          f32
    #   src_ref       : (S, tb, Dsrc)      f32 or bf16 (time-major, straight from HBM)
    #   bias_ref      : (S, tb, 1)         f32  additive mask bias (0 / -1e30)
    #   w_in_ref      : (Din, Dsrc)        f32
    #   w_out_ctx_ref : (Dsrc, Dout_pad)   f32
    #   w_out_inp_ref : (Din, Dout_pad)    f32
    #   out_ref       : (tb, Dout_pad)     f32
    #   attn_ref      : (S, tb, 1)         f32
    inp = inp_ref[...]
    src = src_ref[...].astype(jnp.float32)          # upcast (if bf16) inside VMEM

    # 1) input projection (MXU, 2-D matmul)
    xq = jnp.dot(inp, w_in_ref[...], preferred_element_type=jnp.float32)   # (tb, Dsrc)

    # 2) scores[s, b] = sum_d src[s, b, d] * xq[b, d]
    #    VPU multiply (leading-axis broadcast of xq) + last-axis (lane) reduction.
    #    Kept 3-D (S, tb, 1) so the weights already sit in the sublane-major
    #    layout needed by step 4 -- no in-kernel transposes anywhere.
    scores = jnp.sum(src * xq[None, :, :], axis=-1, keepdims=True)         # (S, tb, 1)
    scores = scores + bias_ref[...]

    # 3) softmax over the source-length axis (leading, untiled axis -> cheap folds)
    m = jnp.max(scores, axis=0, keepdims=True)                             # (1, tb, 1)
    e = jnp.exp(scores - m)                                                # (S, tb, 1)
    l = jnp.sum(e, axis=0, keepdims=True)                                  # (1, tb, 1)
    inv = pl.reciprocal(l, approx=True)            # EUP slot (near free)
    inv = inv * (2.0 - l * inv)                    # one Newton step -> ~f32 exact
    attn = e * inv                                                         # (S, tb, 1)
    attn_ref[...] = attn.astype(attn_ref.dtype)

    # 4) ctx[b, d] = sum_s attn[s, b] * src[s, b, d]
    #    minor-singleton lane broadcast + leading-axis reduction (VPU adds).
    ctx = jnp.sum(src * attn, axis=0)                                      # (tb, Dsrc)

    # 5) output projection with pre-split weights (no concat copy) + tanh
    out = jnp.dot(ctx, w_out_ctx_ref[...], preferred_element_type=jnp.float32)
    out = out + jnp.dot(inp, w_out_inp_ref[...], preferred_element_type=jnp.float32)
    out_ref[...] = jnp.tanh(out).astype(out_ref.dtype)


def prepare_params(w_input_proj, w_output_proj):
    """One-time parameter prep (transpose / split / pad). Do NOT call per forward."""
    w_input_proj = jnp.asarray(w_input_proj, jnp.float32)     # (Dsrc, Din)
    w_output_proj = jnp.asarray(w_output_proj, jnp.float32)   # (Dout, Dsrc + Din)
    d_src = int(w_input_proj.shape[0])
    d_out = int(w_output_proj.shape[0])
    w_in = w_input_proj.T                                     # (Din, Dsrc)
    # PyTorch applies W_out to cat((ctx, input)); split it so the kernel never concats.
    w_out_ctx = w_output_proj[:, :d_src].T                    # (Dsrc, Dout)
    w_out_inp = w_output_proj[:, d_src:].T                    # (Din, Dout)
    d_out_pad = pl.cdiv(d_out, 128) * 128                     # lane-dense output
    if d_out_pad != d_out:
        pad = ((0, 0), (0, d_out_pad - d_out))
        w_out_ctx = jnp.pad(w_out_ctx, pad)
        w_out_inp = jnp.pad(w_out_inp, pad)
    return w_in, w_out_ctx, w_out_inp, d_out


def _vmem_budget_bytes():
    try:
        cap = int(pltpu.get_tpu_info().vmem_capacity_bytes)
    except Exception:
        cap = 64 * 1024 * 1024        # assume the smaller (v7x) VMEM if the query fails
    # Generation-aware scoped-VMEM budget with headroom: ~32 MiB on v7x (64 MiB
    # physical), ~96 MiB on v5e/v6e (128 MiB physical).  Never exceeds physical.
    return max(16 * 1024 * 1024, min(cap - 32 * 1024 * 1024, 96 * 1024 * 1024))


def _pick_batch_tile(B, S, d_src, d_in, d_out_pad, src_bytes, budget):
    """Largest batch tile (multiple of 8) whose working set fits the VMEM budget."""
    if B <= 8:
        return B                                  # tiny batch: one full-dim block
    weights = 2 * 4 * (d_in * d_src + d_src * d_out_pad + d_in * d_out_pad)

    def usage(tb):
        blk = S * tb * d_src
        return (2 * blk * src_bytes               # double-buffered source stream
                + 2 * blk * 4                     # in-kernel f32 upcast + product temps
                + 4 * 4 * S * tb                  # bias in + attn out (double-buffered)
                + 2 * 4 * tb * (d_in + d_out_pad)
                + weights)

    tb = 8
    for cand in (16, 32, 64, 128, 256):
        if cand <= ((B + 7) // 8) * 8 and usage(cand) <= budget:
            tb = cand
    if B >= 16:
        # keep at least 2 grid steps so v7x's two TensorCores both get work
        tb = min(tb, max(8, (((B + 1) // 2) + 7) // 8 * 8))
    return tb


def attention_layer(inp, source_hids, encoder_padding_mask,
                    w_in, w_out_ctx, w_out_inp, d_out):
    """
    inp:                  (B, Din)      float32
    source_hids:          (S, B, Dsrc)  float32 or bfloat16, time-major (as in PyTorch);
                          streamed to the kernel as-is (no wrapper transpose / cast).
    encoder_padding_mask: (S, B) bool or None (True == padded position)
    w_in, w_out_ctx, w_out_inp, d_out: from prepare_params()
    returns: (out (B, Dout) f32, attn_scores (S, B) f32)
    """
    S, B, d_src = source_hids.shape
    d_in = inp.shape[1]
    d_out_pad = w_out_ctx.shape[1]

    inp = inp.astype(jnp.float32)
    if encoder_padding_mask is None:
        bias = jnp.zeros((S, B, 1), jnp.float32)
    else:
        bias = jnp.where(encoder_padding_mask, jnp.float32(_MASK_BIAS),
                         jnp.float32(0.0))[:, :, None]          # (S, B, 1): ~1/Dsrc of src bytes

    budget = _vmem_budget_bytes()
    src_bytes = jnp.dtype(source_hids.dtype).itemsize
    tb = _pick_batch_tile(B, S, d_src, d_in, d_out_pad, src_bytes, budget)
    grid = (pl.cdiv(B, tb),)

    out_pad, attn3 = pl.pallas_call(
        _attention_kernel,
        out_shape=(
            jax.ShapeDtypeStruct((B, d_out_pad), jnp.float32),
            jax.ShapeDtypeStruct((S, B, 1), jnp.float32),
        ),
        grid_spec=pltpu.PrefetchScalarGridSpec(
            num_scalar_prefetch=0,
            grid=grid,
            in_specs=[
                pl.BlockSpec((tb, d_in), lambda b: (b, 0)),            # input
                pl.BlockSpec((S, tb, d_src), lambda b: (0, b, 0)),     # source_hids (time-major)
                pl.BlockSpec((S, tb, 1), lambda b: (0, b, 0)),         # mask bias
                pl.BlockSpec((d_in, d_src), lambda b: (0, 0)),         # W_in
                pl.BlockSpec((d_src, d_out_pad), lambda b: (0, 0)),    # W_out (ctx half)
                pl.BlockSpec((d_in, d_out_pad), lambda b: (0, 0)),     # W_out (input half)
            ],
            out_specs=(
                pl.BlockSpec((tb, d_out_pad), lambda b: (b, 0)),       # out (lane-dense)
                pl.BlockSpec((S, tb, 1), lambda b: (0, b, 0)),         # attn (time-major)
            ),
        ),
        compiler_params=pltpu.CompilerParams(
            dimension_semantics=("parallel",),
            vmem_limit_bytes=int(budget),
        ),
    )(inp, source_hids, bias, w_in, w_out_ctx, w_out_inp)

    out = out_pad[:, :d_out] if d_out != d_out_pad else out_pad
    attn = attn3[:, :, 0]                      # (S, B), already PyTorch's layout
    return out, attn


def _reference(inp, source_hids, encoder_padding_mask, w_input_proj, w_output_proj):
    # Pure-JAX reference mirroring the PyTorch forward.
    x = inp @ w_input_proj.T
    scores = jnp.sum(source_hids * x[None, :, :], axis=2)
    if encoder_padding_mask is not None:
        scores = jnp.where(encoder_padding_mask, -jnp.inf, scores)
    attn = jax.nn.softmax(scores, axis=0)
    ctx = jnp.sum(attn[:, :, None] * source_hids, axis=0)
    out = jnp.tanh(jnp.concatenate([ctx, inp], axis=1) @ w_output_proj.T)
    return out, attn


if __name__ == "__main__":
    key = jax.random.PRNGKey(0)
    B, S = 8, 16
    Din, Dsrc, Dout = 32, 32, 32

    k1, k2, k3, k4 = jax.random.split(key, 4)
    inp = jax.random.normal(k1, (B, Din), dtype=jnp.float32)
    source_hids_f32 = jax.random.normal(k2, (S, B, Dsrc), dtype=jnp.float32)
    # Keep the encoder states bf16 in HBM (done once, at "encoder output" time):
    # halves the dominant DMA stream.  The kernel streams them untouched.
    source_hids = source_hids_f32.astype(jnp.bfloat16)

    # Deterministic parameter init, matching nn.Linear(...).weight.uniform_(-0.1, 0.1)
    w_input_proj = jax.random.uniform(k3, (Dsrc, Din), minval=-0.1, maxval=0.1,
                                      dtype=jnp.float32)
    w_output_proj = jax.random.uniform(k4, (Dout, Din + Dsrc), minval=-0.1, maxval=0.1,
                                       dtype=jnp.float32)

    # Padding mask: pad the tail of the source sequence, varying per batch element.
    lengths = jnp.array([16, 12, 10, 16, 8, 14, 16, 9], dtype=jnp.int32)   # (B,)
    pos = jnp.arange(S, dtype=jnp.int32)[:, None]                          # (S, 1)
    encoder_padding_mask = pos >= lengths[None, :]                         # (S, B) bool

    # One-time parameter preparation (out of the per-call path).
    w_in, w_out_ctx, w_out_inp, d_out = prepare_params(w_input_proj, w_output_proj)

    out, attn = attention_layer(inp, source_hids, encoder_padding_mask,
                                w_in, w_out_ctx, w_out_inp, d_out)
    out = jax.block_until_ready(out)
    attn = jax.block_until_ready(attn)

    # Reference uses the same bf16-rounded source values (upcast to f32), so the
    # only divergence is kernel-internal arithmetic (approx reciprocal + Newton,
    # EUP exp/tanh, f32 MXU passes).
    ref_out, ref_attn = _reference(inp, source_hids.astype(jnp.float32),
                                   encoder_padding_mask, w_input_proj, w_output_proj)
    assert out.shape == (B, Dout) and attn.shape == (S, B)
    assert jnp.allclose(out, ref_out, atol=2e-3, rtol=2e-3), \
        float(jnp.max(jnp.abs(out - ref_out)))
    assert jnp.allclose(attn, ref_attn, atol=2e-3, rtol=2e-3), \
        float(jnp.max(jnp.abs(attn - ref_attn)))

    print("KERNEL_OK")
</pallas_src>

<mosaic_0001>
module attributes {stable_mosaic.version = 11 : i64} {
  func.func @_attention_kernel(%arg0: i32, %arg1: memref<8x32xf32, #tpu.memory_space<vmem>>, %arg2: memref<16x8x32xbf16, #tpu.memory_space<vmem>>, %arg3: memref<16x8x1xf32, #tpu.memory_space<vmem>>, %arg4: memref<32x32xf32, #tpu.memory_space<vmem>>, %arg5: memref<32x128xf32, #tpu.memory_space<vmem>>, %arg6: memref<32x128xf32, #tpu.memory_space<vmem>>, %arg7: memref<8x128xf32, #tpu.memory_space<vmem>>, %arg8: memref<16x8x1xf32, #tpu.memory_space<vmem>>) attributes {dimension_semantics = [#tpu.dimension_semantics<parallel>], iteration_bounds = array<i64: 1>, scalar_prefetch = 0 : i64, scratch_operands = 0 : i64, tpu.core_type = #tpu.core_type<tc>, window_params = [{transform_indices = @transform_0, window_bounds = array<i64: 8, 32>}, {transform_indices = @transform_1, window_bounds = array<i64: 16, 8, 32>}, {transform_indices = @transform_2, window_bounds = array<i64: 16, 8, 1>}, {pipeline_mode = #tpu.pipeline_mode<synchronous>, transform_indices = @transform_3, window_bounds = array<i64: 32, 32>}, {pipeline_mode = #tpu.pipeline_mode<synchronous>, transform_indices = @transform_4, window_bounds = array<i64: 32, 128>}, {pipeline_mode = #tpu.pipeline_mode<synchronous>, transform_indices = @transform_5, window_bounds = array<i64: 32, 128>}, {transform_indices = @transform_6, window_bounds = array<i64: 8, 128>}, {transform_indices = @transform_7, window_bounds = array<i64: 16, 8, 1>}]} {
    %c0 = arith.constant 0 : index
    %c0_0 = arith.constant 0 : index
    %0 = vector.load %arg1[%c0, %c0_0] : memref<8x32xf32, #tpu.memory_space<vmem>>, vector<8x32xf32>
    %c0_1 = arith.constant 0 : index
    %c0_2 = arith.constant 0 : index
    %c0_3 = arith.constant 0 : index
    %1 = vector.load %arg2[%c0_1, %c0_2, %c0_3] : memref<16x8x32xbf16, #tpu.memory_space<vmem>>, vector<16x8x32xbf16>
    %2 = arith.extf %1 : vector<16x8x32xbf16> to vector<16x8x32xf32>
    %c0_4 = arith.constant 0 : index
    %c0_5 = arith.constant 0 : index
    %3 = vector.load %arg4[%c0_4, %c0_5] : memref<32x32xf32, #tpu.memory_space<vmem>>, vector<32x32xf32>
    %cst = arith.constant dense<0.000000e+00> : vector<8x32xf32>
    %4 = tpu.matmul %0, %3, %cst {dimension_numbers = #tpu.dot_dimension_numbers<[1], [0], [0], [1], [0, 0, 1, 1], [], []>} : vector<8x32xf32>, vector<32x32xf32>, vector<8x32xf32> -> vector<8x32xf32>
    %5 = vector.shape_cast %4 : vector<8x32xf32> to vector<1x8x32xf32>
    %6 = vector.broadcast %5 : vector<1x8x32xf32> to vector<16x8x32xf32>
    %7 = arith.mulf %2, %6 : vector<16x8x32xf32>
    %cst_6 = arith.constant dense<0.000000e+00> : vector<16x8xf32>
    %8 = vector.multi_reduction <add>, %7, %cst_6 [2] : vector<16x8x32xf32> to vector<16x8xf32>
    %9 = vector.shape_cast %8 : vector<16x8xf32> to vector<16x8x1xf32>
    %c0_7 = arith.constant 0 : index
    %c0_8 = arith.constant 0 : index
    %c0_9 = arith.constant 0 : index
    %10 = vector.load %arg3[%c0_7, %c0_8, %c0_9] : memref<16x8x1xf32, #tpu.memory_space<vmem>>, vector<16x8x1xf32>
    %11 = arith.addf %9, %10 : vector<16x8x1xf32>
    %cst_10 = arith.constant dense<0xFF800000> : vector<8x1xf32>
    %12 = vector.multi_reduction <maximumf>, %11, %cst_10 [0] : vector<16x8x1xf32> to vector<8x1xf32>
    %13 = vector.shape_cast %12 : vector<8x1xf32> to vector<1x8x1xf32>
    %14 = vector.broadcast %13 : vector<1x8x1xf32> to vector<16x8x1xf32>
    %15 = arith.subf %11, %14 : vector<16x8x1xf32>
    %16 = math.exp %15 : vector<16x8x1xf32>
    %cst_11 = arith.constant dense<0.000000e+00> : vector<8x1xf32>
    %17 = vector.multi_reduction <add>, %16, %cst_11 [0] : vector<16x8x1xf32> to vector<8x1xf32>
    %18 = vector.shape_cast %17 : vector<8x1xf32> to vector<1x8x1xf32>
    %19 = tpu.reciprocal %18 {approx = true} : vector<1x8x1xf32> -> vector<1x8x1xf32>
    %20 = arith.mulf %18, %19 : vector<1x8x1xf32>
    %cst_12 = arith.constant 2.000000e+00 : f32
    %21 = vector.broadcast %cst_12 : f32 to vector<1x8x1xf32>
    %22 = arith.subf %21, %20 : vector<1x8x1xf32>
    %23 = arith.mulf %19, %22 : vector<1x8x1xf32>
    %24 = vector.broadcast %23 : vector<1x8x1xf32> to vector<16x8x1xf32>
    %25 = arith.mulf %16, %24 : vector<16x8x1xf32>
    %c0_13 = arith.constant 0 : index
    %c0_14 = arith.constant 0 : index
    %c0_15 = arith.constant 0 : index
    %26 = vector.load %arg8[%c0_13, %c0_14, %c0_15] : memref<16x8x1xf32, #tpu.memory_space<vmem>>, vector<16x8x1xf32>
    tpu.vector_store %arg8[%c0_13, %c0_14, %c0_15], %25 {strides = array<i32>} : memref<16x8x1xf32, #tpu.memory_space<vmem>>, vector<16x8x1xf32>,
    %27 = vector.broadcast %25 : vector<16x8x1xf32> to vector<16x8x32xf32>
    %28 = arith.mulf %2, %27 : vector<16x8x32xf32>
    %cst_16 = arith.constant dense<0.000000e+00> : vector<8x32xf32>
    %29 = vector.multi_reduction <add>, %28, %cst_16 [0] : vector<16x8x32xf32> to vector<8x32xf32>
    %c0_17 = arith.constant 0 : index
    %c0_18 = arith.constant 0 : index
    %30 = vector.load %arg5[%c0_17, %c0_18] : memref<32x128xf32, #tpu.memory_space<vmem>>, vector<32x128xf32>
    %cst_19 = arith.constant dense<0.000000e+00> : vector<8x128xf32>
    %31 = tpu.matmul %29, %30, %cst_19 {dimension_numbers = #tpu.dot_dimension_numbers<[1], [0], [0], [1], [0, 0, 1, 1], [], []>} : vector<8x32xf32>, vector<32x128xf32>, vector<8x128xf32> -> vector<8x128xf32>
    %c0_20 = arith.constant 0 : index
    %c0_21 = arith.constant 0 : index
    %32 = vector.load %arg6[%c0_20, %c0_21] : memref<32x128xf32, #tpu.memory_space<vmem>>, vector<32x128xf32>
    %cst_22 = arith.constant dense<0.000000e+00> : vector<8x128xf32>
    %33 = tpu.matmul %0, %32, %cst_22 {dimension_numbers = #tpu.dot_dimension_numbers<[1], [0], [0], [1], [0, 0, 1, 1], [], []>} : vector<8x32xf32>, vector<32x128xf32>, vector<8x128xf32> -> vector<8x128xf32>
    %34 = arith.addf %31, %33 : vector<8x128xf32>
    %35 = math.tanh %34 : vector<8x128xf32>
    %c0_23 = arith.constant 0 : index
    %c0_24 = arith.constant 0 : index
    %36 = vector.load %arg7[%c0_23, %c0_24] : memref<8x128xf32, #tpu.memory_space<vmem>>, vector<8x128xf32>
    tpu.vector_store %arg7[%c0_23, %c0_24], %35 {strides = array<i32>} : memref<8x128xf32, #tpu.memory_space<vmem>>, vector<8x128xf32>,
    return
  }
  func.func @transform_0(%arg0: i32) -> (i32, i32) {
    %c0_i32 = arith.constant 0 : i32
    %c0_i32_0 = arith.constant 0 : i32
    return %arg0, %c0_i32 : i32, i32
  }
  func.func @transform_1(%arg0: i32) -> (i32, i32, i32) {
    %c0_i32 = arith.constant 0 : i32
    %c0_i32_0 = arith.constant 0 : i32
    %c0_i32_1 = arith.constant 0 : i32
    return %c0_i32, %arg0, %c0_i32_0 : i32, i32, i32
  }
  func.func @transform_2(%arg0: i32) -> (i32, i32, i32) {
    %c0_i32 = arith.constant 0 : i32
    %c0_i32_0 = arith.constant 0 : i32
    %c0_i32_1 = arith.constant 0 : i32
    return %c0_i32, %arg0, %c0_i32_0 : i32, i32, i32
  }
  func.func @transform_3(%arg0: i32) -> (i32, i32) {
    %c0_i32 = arith.constant 0 : i32
    %c0_i32_0 = arith.constant 0 : i32
    %c0_i32_1 = arith.constant 0 : i32
    return %c0_i32, %c0_i32_0 : i32, i32
  }
  func.func @transform_4(%arg0: i32) -> (i32, i32) {
    %c0_i32 = arith.constant 0 : i32
    %c0_i32_0 = arith.constant 0 : i32
    %c0_i32_1 = arith.constant 0 : i32
    return %c0_i32, %c0_i32_0 : i32, i32
  }
  func.func @transform_5(%arg0: i32) -> (i32, i32) {
    %c0_i32 = arith.constant 0 : i32
    %c0_i32_0 = arith.constant 0 : i32
    %c0_i32_1 = arith.constant 0 : i32
    return %c0_i32, %c0_i32_0 : i32, i32
  }
  func.func @transform_6(%arg0: i32) -> (i32, i32) {
    %c0_i32 = arith.constant 0 : i32
    %c0_i32_0 = arith.constant 0 : i32
    return %arg0, %c0_i32 : i32, i32
  }
  func.func @transform_7(%arg0: i32) -> (i32, i32, i32) {
    %c0_i32 = arith.constant 0 : i32
    %c0_i32_0 = arith.constant 0 : i32
    %c0_i32_1 = arith.constant 0 : i32
    return %c0_i32, %arg0, %c0_i32_0 : i32, i32, i32
  }
}

</mosaic_0001>

<bundles_post_ra>
// kernel: tpu_custom_call.1
= control target key start
LH: loop header
LB: loop body
LE: loop exit
PB: predicated region body
PF: predicated region fallthrough
CT: control target
= control target key end

     0   :  { %13 = vsyncpa [#allocation3], 0  ;;  %s1194_s0 = inlined_call_operand.vmem [shape: f32[8,32], index: 0, kind: input, shape index: {}]   ;;  %s1195_s1 = inlined_call_operand.vmem [shape: bf16[16,8,32], index: 1, kind: input, shape index: {}]   ;;  %s1196_s2 = inlined_call_operand.vmem [shape: f32[16,8,1], index: 2, kind: input, shape index: {}]   ;;  %s1197_s3 = inlined_call_operand.vmem [shape: f32[32,32], index: 3, kind: input, shape index: {}]   ;;  %s1198_s4 = inlined_call_operand.vmem [shape: f32[32,128], index: 4, kind: input, shape index: {}]   ;;  %s1199_s5 = inlined_call_operand.hbm [shape: f32[32,128], index: 5, kind: input, shape index: {}]   ;;  %s1200_s6 = inlined_call_operand.hbm [shape: f32[8,128], index: 6, kind: output, shape index: {0}]   ;;  %s1201_s7 = inlined_call_operand.vmem [shape: f32[16,8,1], index: 7, kind: output, shape index: {1}]  }
   0x1   :  { %14 = vsyncpa [#allocation4], 0  ;;  %s29_s26 = sshll.u32 %s1199_s5, 4  ;;  %s685_s27 = smov [#allocation2]   ;;  %s30_s26 = int_to_ptr.hbm [resolvable:$true] %s29_s26 }
   0x2   :  { %s31_s28 = sshll.u32 %s685_s27, 4  ;;  %s686_s29 = smov 128   ;;  %s32_s28 = int_to_ptr.vmem [resolvable:$true] %s31_s28 }
   0x3   :  { %s687_s30 = smov 8  }
   0x4   :  { %37 = dma.hbm_to_vmem [thread:$0]  %s30_s26, 512, %s32_s28, [#allocation3], %s686_s29, %s686_s29, %s687_s30  }
   0x5   :  { %681 = dma.done.wait [#allocation3], 512  }
   0x6   :  { %682 = vsyncadd [#allocation3], 4294966784  ;;  %v78_v0 = vld [vmem:[%s1197_s3 + $0x18] sm:$0xff]  ;;  %v77_v1 = vld [vmem:[%s1197_s3 + $0x10] sm:$0xff]  ;;  %vm79_vm0 = vcmask 261120   ;;  %vm199_vm1 = vcmask 7168  }
   0x7   :  { %95 = vmatpush.msra.mxu0 %v78_v0  ;;  %v76_v2 = vld [vmem:[%s1197_s3 + $0x8] sm:$0xff]  ;;  %v75_v3 = vld [vmem:[%s1197_s3] sm:$0xff]  ;;  %v755_v5 = vld [vmem:[%s1195_s1 + $0x10] sm:$0xff]   ;;  %s533_s22 = sshll.u32 %s1200_s6, 4  ;;  %s534_s22 = int_to_ptr.hbm [resolvable:$true] %s533_s22 }
   0x8   :  { %v748_v4 = vld [vmem:[%s1194_s0] sm:$0xff]  ;;  %v760_v6 = vld [vmem:[%s1195_s1 + $0x8] sm:$0xff]   ;;  %v560_v8 = vunpack.c.l.bf16 %v755_v5  ;;  %v561_v15 = vunpack.c.h.bf16 %v755_v5  ;;  %v804_v25 = vld [vmem:[%s1195_s1 + $0x18] sm:$0xff]  }
   0x9   :  { %96 = vmatpush.msra.mxu0 %v77_v1  ;;  %v765_v7 = vld [vmem:[%s1195_s1] sm:$0xff]   ;;  %v556_v9 = vunpack.c.l.bf16 %v760_v6  ;;  %v557_v19 = vunpack.c.h.bf16 %v760_v6  ;;  %v565_v29 = vunpack.c.h.bf16 %v804_v25  ;;  %v564_v31 = vunpack.c.l.bf16 %v804_v25  ;;  %v824_v35 = vld [vmem:[%s1195_s1 + $0x28] sm:$0xff]   ;;  %v844_v45 = vld [vmem:[%s1195_s1 + $0x38] sm:$0xff]  }
   0xa   :  { %v552_v10 = vunpack.c.l.bf16 %v765_v7  ;;  %v553_v20 = vunpack.c.h.bf16 %v765_v7  ;;  %v799_v24 = vld [vmem:[%s1195_s1 + $0x20] sm:$0xff]   ;;  %v1205_v38 = vunpack.c.h.bf16 %v824_v35  ;;  %v572_v39 = vunpack.c.l.bf16 %v824_v35  ;;  %v849_v46 = vld [vmem:[%s1195_s1 + $0x30] sm:$0xff]   ;;  %v480_v6 = vld [vmem:[#allocation2 + $0x18] sm:$0xff] }
   0xb   :  { %97 = vmatpush.msra.mxu0 %v76_v2  ;;  %v568_v28 = vunpack.c.l.bf16 %v799_v24  ;;  %v569_v41 = vunpack.c.h.bf16 %v799_v24  ;;  %v1202_v49 = vunpack.c.l.bf16 %v844_v45  ;;  %v1204_v50 = vunpack.c.h.bf16 %v849_v46  ;;  %493 = vmatpush.msra.mxu1 %v480_v6 }
   0xc   :  { %v576_v52 = vunpack.c.l.bf16 %v849_v46  ;;  %v1203_v59 = vunpack.c.h.bf16 %v844_v45  ;;  %v1206_v24 = vunpack.c.h.bf16 %v824_v35  ;;  %v1209_v35 = vunpack.c.l.bf16 %v844_v45 }
   0xd   :  { %98 = vmatpush.msra.mxu0 %v75_v3 }
   0xe   :  { %547 = vmatmul.msk.f32.vlgmr.msra.gmra.mxu0 %vm79_vm0, %v748_v4 }
  0x8b   :  { %v770_v11 = vpop.f32.mrf.mxu0 }
  0x8c   :  { %v107_v12 = vmul.f32 %v560_v8, %v770_v11  ;;  %v105_v13 = vmul.f32 %v556_v9, %v770_v11  ;;  %v103_v14 = vmul.f32 %v552_v10, %v770_v11  ;;  %v108_v21 = vmul.f32 %v561_v15, %v770_v11 }
  0x8d   :  { %v106_v22 = vmul.f32 %v557_v19, %v770_v11  ;;  %v104_v23 = vmul.f32 %v553_v20, %v770_v11  ;;  %v111_v32 = vmul.f32 %v568_v28, %v770_v11  ;;  %v110_v33 = vmul.f32 %v565_v29, %v770_v11 }
  0x8e   :  { %v131_v16 = vsel %vm79_vm0, %v107_v12, 0.0  ;;  %v125_v17 = vsel %vm79_vm0, %v105_v13, 0.0  ;;  %v119_v18 = vsel %vm79_vm0, %v103_v14, 0.0  ;;  %v134_v26 = vsel %vm79_vm0, %v108_v21, 0.0  ;;  %v171_v21 = vld [vmem:[%s1196_s2 + $0x20] sm:$0xff] }
  0x8f   :  { %132 = vadd.xlane.f32.xlu2 %v131_v16  ;;  %126 = vadd.xlane.f32.xlu1 %v125_v17  ;;  %v128_v27 = vsel %vm79_vm0, %v106_v22, 0.0  ;;  %v122_v30 = vsel %vm79_vm0, %v104_v23, 0.0  ;;  %v109_v34 = vmul.f32 %v564_v31, %v770_v11  ;;  %v143_v36 = vsel %vm79_vm0, %v111_v32, 0.0  ;;  %v172_v22 = vld [vmem:[%s1196_s2 + $0x28] sm:$0xff] }
  0x90   :  { %120 = vadd.xlane.f32.xlu0 %v119_v18  ;;  %v140_v37 = vsel %vm79_vm0, %v110_v33, 0.0  ;;  %v114_v42 = vmul.f32 %v1205_v38, %v770_v11  ;;  %v113_v43 = vmul.f32 %v572_v39, %v770_v11  ;;  %v112_v44 = vmul.f32 %v569_v41, %v770_v11  ;;  %v168_v23 = vld [vmem:[%s1196_s2 + $0x8] sm:$0xff] }
  0x91   :  { %v137_v40 = vsel %vm79_vm0, %v109_v34, 0.0  ;;  %v117_v53 = vmul.f32 %v1202_v49, %v770_v11  ;;  %v116_v54 = vmul.f32 %v1204_v50, %v770_v11  ;;  %v115_v55 = vmul.f32 %v576_v52, %v770_v11 }
  0x92   :  { %v152_v47 = vsel %vm79_vm0, %v114_v42, 0.0  ;;  %v149_v48 = vsel %vm79_vm0, %v113_v43, 0.0  ;;  %v146_v51 = vsel %vm79_vm0, %v112_v44, 0.0  ;;  %v118_v60 = vmul.f32 %v1203_v59, %v770_v11  ;;  %v167_v11 = vld [vmem:[%s1196_s2] sm:$0xff]  ;;  %v170_v43 = vld [vmem:[%s1196_s2 + $0x18] sm:$0xff] }
  0x93   :  { %v161_v56 = vsel %vm79_vm0, %v117_v53, 0.0  ;;  %v158_v57 = vsel %vm79_vm0, %v116_v54, 0.0  ;;  %v155_v58 = vsel %vm79_vm0, %v115_v55, 0.0  ;;  %v688_v42 = vmov 0   ;;  %v178_v44 = vld [vmem:[%s1196_s2 + $0x58] sm:$0xff]  ;;  %v180_v53 = vld [vmem:[%s1196_s2 + $0x68] sm:$0xff] }
  0x94   :  { %v164_v61 = vsel %vm79_vm0, %v118_v60, 0.0  ;;  %596 = vset.pattern.permute.xlu0 %v688_v42  ;;  %595 = vset.pattern.permute.xlu2 %v688_v42  ;;  %v179_v55 = vld [vmem:[%s1196_s2 + $0x60] sm:$0xff] }
  0x95   :  { %594 = vset.pattern.permute.xlu1 %v688_v42 }
  0x97   :  { %135 = vadd.xlane.f32.xlu2 %v134_v26  ;;  %129 = vadd.xlane.f32.xlu1 %v128_v27  ;;  %v169_v27 = vld [vmem:[%s1196_s2 + $0x10] sm:$0xff] }
  0x98   :  { %123 = vadd.xlane.f32.xlu0 %v122_v30  ;;  %v175_v30 = vld [vmem:[%s1196_s2 + $0x40] sm:$0xff] }
  0x9f   :  { %144 = vadd.xlane.f32.xlu2 %v143_v36  ;;  %141 = vadd.xlane.f32.xlu1 %v140_v37  ;;  %v174_v36 = vld [vmem:[%s1196_s2 + $0x38] sm:$0xff]  ;;  %v173_v37 = vld [vmem:[%s1196_s2 + $0x30] sm:$0xff] }
  0xa0   :  { %138 = vadd.xlane.f32.xlu0 %v137_v40  ;;  %v176_v40 = vld [vmem:[%s1196_s2 + $0x48] sm:$0xff] }
  0xa7   :  { %153 = vadd.xlane.f32.xlu2 %v152_v47  ;;  %150 = vadd.xlane.f32.xlu1 %v149_v48 }
  0xa8   :  { %147 = vadd.xlane.f32.xlu0 %v146_v51  ;;  %v177_v51 = vld [vmem:[%s1196_s2 + $0x50] sm:$0xff] }
  0xaf   :  { %162 = vadd.xlane.f32.xlu2 %v161_v56  ;;  %159 = vadd.xlane.f32.xlu1 %v158_v57 }
  0xb0   :  { %156 = vadd.xlane.f32.xlu0 %v155_v58 }
  0xb8   :  { %165 = vadd.xlane.f32.xlu0 %v164_v61 }
 0x102   :  { %v133_v62 = vpop.xlane.xlu2 %132  ;;  %v127_v63 = vpop.xlane.xlu1 %126 }
 0x103   :  { %v121_v0 = vpop.xlane.xlu0 %120  ;;  %v886_v26 = vadd.f32 %v171_v21, %v133_v62  ;;  %v185_v47 = vadd.f32 %v169_v27, %v127_v63 }
 0x104   :  { %v894_v32 = vadd.f32 %v167_v11, %v121_v0 }
 0x105   :  { %v204_v57 = vsel %vm199_vm1, %v886_v26, -inf }
 0x106   :  { %v200_v62 = vsel %vm199_vm1, %v894_v32, -inf }
 0x107   :  { %v205_v27 = vmax.f32 %v200_v62, %v204_v57 }
 0x10a   :  { %v136_v1 = vpop.xlane.xlu2 %135  ;;  %v130_v2 = vpop.xlane.xlu1 %129 }
 0x10b   :  { %v124_v3 = vpop.xlane.xlu0 %123  ;;  %v896_v33 = vadd.f32 %v172_v22, %v136_v1  ;;  %v186_v0 = vadd.f32 %v170_v43, %v130_v2 }
 0x10c   :  { %v898_v34 = vadd.f32 %v168_v23, %v124_v3  ;;  %v181_v3 = vld [vmem:[%s1196_s2 + $0x70] sm:$0xff] }
 0x10d   :  { %v206_v63 = vsel %vm199_vm1, %v896_v33, -inf }
 0x10e   :  { %v201_v1 = vsel %vm199_vm1, %v898_v34, -inf }
 0x112   :  { %v145_v12 = vpop.xlane.xlu2 %144  ;;  %v142_v13 = vpop.xlane.xlu1 %141 }
 0x113   :  { %v139_v14 = vpop.xlane.xlu0 %138  ;;  %v915_v48 = vadd.f32 %v175_v30, %v145_v12  ;;  %v928_v58 = vadd.f32 %v174_v36, %v142_v13  ;;  %v203_v30 = vsel %vm199_vm1, %v186_v0, -inf  ;;  %v207_v36 = vmax.f32 %v201_v1, %v206_v63 }
 0x114   :  { %v930_v60 = vadd.f32 %v173_v37, %v139_v14  ;;  %v182_v37 = vld [vmem:[%s1196_s2 + $0x78] sm:$0xff] }
 0x115   :  { %v212_v11 = vsel %vm199_vm1, %v915_v48, -inf  ;;  %v210_v2 = vsel %vm199_vm1, %v928_v58, -inf }
 0x116   :  { %v208_v22 = vsel %vm199_vm1, %v930_v60, -inf }
 0x11a   :  { %v151_v16 = vpop.xlane.xlu1 %150  ;;  %v154_v17 = vpop.xlane.xlu2 %153 }
 0x11b   :  { %v148_v18 = vpop.xlane.xlu0 %147  ;;  %v943_v13 = vadd.f32 %v178_v44, %v154_v17  ;;  %v945_v14 = vadd.f32 %v177_v51, %v151_v16  ;;  %v202_v16 = vsel %vm199_vm1, %v185_v47, -inf  ;;  %v213_v51 = vmax.f32 %v205_v27, %v212_v11 }
 0x11c   :  { %v932_v61 = vadd.f32 %v176_v40, %v148_v18 }
 0x11d   :  { %v218_v40 = vsel %vm199_vm1, %v943_v13, -inf  ;;  %v216_v42 = vsel %vm199_vm1, %v945_v14, -inf }
 0x11e   :  { %v214_v23 = vsel %vm199_vm1, %v932_v61, -inf }
 0x122   :  { %v160_v54 = vpop.xlane.xlu1 %159  ;;  %v163_v12 = vpop.xlane.xlu2 %162 }
 0x123   :  { %v157_v56 = vpop.xlane.xlu0 %156  ;;  %v947_v18 = vadd.f32 %v180_v53, %v160_v54  ;;  %v959_v17 = vadd.f32 %v181_v3, %v163_v12  ;;  %v211_v53 = vmax.f32 %v203_v30, %v210_v2  ;;  %v209_v54 = vmax.f32 %v202_v16, %v208_v22 }
 0x124   :  { %v949_v21 = vadd.f32 %v179_v55, %v157_v56  ;;  %v215_v55 = vmax.f32 %v207_v36, %v214_v23 }
 0x125   :  { %v222_v43 = vsel %vm199_vm1, %v947_v18, -inf  ;;  %v224_v57 = vsel %vm199_vm1, %v959_v17, -inf  ;;  %v219_v63 = vmax.f32 %v211_v53, %v218_v40  ;;  %v217_v1 = vmax.f32 %v209_v54, %v216_v42 }
 0x126   :  { %v220_v44 = vsel %vm199_vm1, %v949_v21, -inf  ;;  %v223_v3 = vmax.f32 %v215_v55, %v222_v43 }
 0x127   :  { %v221_v12 = vmax.f32 %v213_v51, %v220_v44  ;;  %v225_v59 = vmax.f32 %v217_v1, %v224_v57 }
 0x129   :  { %v228_v38 = vmax.f32 %v221_v12, %v223_v3 }
 0x12b   :  { %v166_v56 = vpop.xlane.xlu0 %165 }
 0x12c   :  { %v976_v62 = vadd.f32 %v182_v37, %v166_v56 }
 0x12e   :  { %v226_v49 = vsel %vm199_vm1, %v976_v62, -inf }
 0x12f   :  { %v227_v50 = vmax.f32 %v219_v63, %v226_v49 }
 0x131   :  { %v229_v11 = vmax.f32 %v225_v59, %v227_v50 }
 0x133   :  { %v980_v2 = vmax.f32 %v228_v38, %v229_v11 }
 0x135   :  { %v231_v22 = vsub.f32 %v894_v32, %v980_v2  ;;  %v232_v23 = vsub.f32 %v898_v34, %v980_v2  ;;  %v233_v16 = vsub.f32 %v185_v47, %v980_v2  ;;  %v234_v27 = vsub.f32 %v186_v0, %v980_v2 }
 0x136   :  { %v235_v30 = vsub.f32 %v886_v26, %v980_v2  ;;  %v236_v49 = vsub.f32 %v896_v33, %v980_v2  ;;  %v237_v59 = vsub.f32 %v930_v60, %v980_v2  ;;  %v238_v34 = vsub.f32 %v928_v58, %v980_v2 }
 0x137   :  { %v247_v36 = vmul.f32 1.442695, %v231_v22  ;;  %v249_v37 = vmul.f32 1.442695, %v232_v23  ;;  %v251_v38 = vmul.f32 1.442695, %v233_v16  ;;  %v239_v26 = vsub.f32 %v915_v48, %v980_v2 }
 0x138   :  { %v253_v50 = vmul.f32 1.442695, %v234_v27  ;;  %v255_v32 = vmul.f32 1.442695, %v235_v30  ;;  %v257_v47 = vmul.f32 1.442695, %v236_v49  ;;  %v240_v60 = vsub.f32 %v932_v61, %v980_v2 }
 0x139   :  { %597 = vpow2.f32 %v247_v36  ;;  %v259_v0 = vmul.f32 1.442695, %v237_v59  ;;  %v261_v42 = vmul.f32 1.442695, %v238_v34  ;;  %v241_v51 = vsub.f32 %v945_v14, %v980_v2 }
 0x13a   :  { %599 = vpow2.f32 %v249_v37  ;;  %v263_v53 = vmul.f32 1.442695, %v239_v26  ;;  %v242_v56 = vsub.f32 %v943_v13, %v980_v2  ;;  %v265_v57 = vmul.f32 1.442695, %v240_v60 }
 0x13b   :  { %601 = vpow2.f32 %v251_v38  ;;  %v243_v14 = vsub.f32 %v949_v21, %v980_v2  ;;  %v267_v12 = vmul.f32 1.442695, %v241_v51  ;;  %v244_v13 = vsub.f32 %v947_v18, %v980_v2 }
 0x13c   :  { %603 = vpow2.f32 %v253_v50  ;;  %v269_v16 = vmul.f32 1.442695, %v242_v56  ;;  %v245_v21 = vsub.f32 %v959_v17, %v980_v2  ;;  %v246_v18 = vsub.f32 %v976_v62, %v980_v2 }
 0x13d   :  { %605 = vpow2.f32 %v255_v32  ;;  %v271_v37 = vmul.f32 1.442695, %v243_v14  ;;  %v273_v59 = vmul.f32 1.442695, %v244_v13 }
 0x13e   :  { %607 = vpow2.f32 %v257_v47  ;;  %v275_v17 = vmul.f32 1.442695, %v245_v21 }
 0x13f   :  { %v998_v33 = vpop.eup %597  ;;  %609 = vpow2.f32 %v259_v0 }
 0x140   :  { %v1000_v40 = vpop.eup %599  ;;  %v279_v43 = vsel %vm199_vm1, %v998_v33, 0.0  ;;  %611 = vpow2.f32 %v261_v42  ;;  %v277_v42 = vmul.f32 1.442695, %v246_v18 }
 0x141   :  { %v1006_v58 = vpop.eup %601  ;;  %v280_v44 = vsel %vm199_vm1, %v1000_v40, 0.0  ;;  %613 = vpow2.f32 %v263_v53 }
 0x142   :  { %v1010_v48 = vpop.eup %603  ;;  %v281_v54 = vadd.f32 %v280_v44, %v279_v43  ;;  %v282_v61 = vsel %vm199_vm1, %v1006_v58, 0.0  ;;  %615 = vpow2.f32 %v265_v57 }
 0x143   :  { %v1016_v55 = vpop.eup %605  ;;  %v284_v1 = vsel %vm199_vm1, %v1010_v48, 0.0  ;;  %617 = vpow2.f32 %v267_v12 }
 0x144   :  { %v283_v63 = vadd.f32 %v282_v61, %v281_v54  ;;  %v1022_v3 = vpop.eup %607  ;;  %v286_v22 = vsel %vm199_vm1, %v1016_v55, 0.0  ;;  %619 = vpow2.f32 %v269_v16 }
 0x145   :  { %v1028_v23 = vpop.eup %609  ;;  %v288_v30 = vsel %vm199_vm1, %v1022_v3, 0.0  ;;  %621 = vpow2.f32 %v271_v37 }
 0x146   :  { %v285_v11 = vadd.f32 %v284_v1, %v283_v63  ;;  %v1034_v36 = vpop.eup %611  ;;  %v290_v38 = vsel %vm199_vm1, %v1028_v23, 0.0  ;;  %623 = vpow2.f32 %v273_v59 }
 0x147   :  { %v1040_v50 = vpop.eup %613  ;;  %v292_v34 = vsel %vm199_vm1, %v1034_v36, 0.0  ;;  %625 = vpow2.f32 %v275_v17 }
 0x148   :  { %v287_v27 = vadd.f32 %v286_v22, %v285_v11  ;;  %v616_v47 = vpop.eup %615  ;;  %v294_v0 = vsel %vm199_vm1, %v1040_v50, 0.0  ;;  %627 = vpow2.f32 %v277_v42 }
 0x149   :  { %v618_v60 = vpop.eup %617  ;;  %v296_v44 = vsel %vm199_vm1, %v616_v47, 0.0 }
 0x14a   :  { %v289_v49 = vadd.f32 %v288_v30, %v287_v27  ;;  %v620_v62 = vpop.eup %619  ;;  %v298_v51 = vsel %vm199_vm1, %v618_v60, 0.0 }
 0x14b   :  { %v622_v53 = vpop.eup %621  ;;  %v300_v61 = vsel %vm199_vm1, %v620_v62, 0.0 }
 0x14c   :  { %v291_v32 = vadd.f32 %v290_v38, %v289_v49  ;;  %v624_v56 = vpop.eup %623  ;;  %v302_v63 = vsel %vm199_vm1, %v622_v53, 0.0 }
 0x14d   :  { %v626_v1 = vpop.eup %625  ;;  %v304_v12 = vsel %vm199_vm1, %v624_v56, 0.0 }
 0x14e   :  { %v293_v26 = vadd.f32 %v292_v34, %v291_v32  ;;  %v628_v11 = vpop.eup %627  ;;  %v306_v13 = vsel %vm199_vm1, %v626_v1, 0.0 }
 0x14f   :  { %v308_v27 = vsel %vm199_vm1, %v628_v11, 0.0 }
 0x150   :  { %v295_v43 = vadd.f32 %v294_v0, %v293_v26 }
 0x152   :  { %v297_v2 = vadd.f32 %v296_v44, %v295_v43 }
 0x154   :  { %v299_v54 = vadd.f32 %v298_v51, %v297_v2 }
 0x156   :  { %v301_v57 = vadd.f32 %v300_v61, %v299_v54 }
 0x158   :  { %v303_v14 = vadd.f32 %v302_v63, %v301_v57 }
 0x15a   :  { %v305_v22 = vadd.f32 %v304_v12, %v303_v14 }
 0x15c   :  { %v307_v16 = vadd.f32 %v306_v13, %v305_v22 }
 0x15e   :  { %v309_v30 = vadd.f32 %v308_v27, %v307_v16  ;;  %v473_v16 = vld [vmem:[%s1198_s4] sm:$0xff]  ;;  %v479_v27 = vld [vmem:[#allocation2 + $0x10] sm:$0xff] }
 0x15f   :  { %494 = vmatpush.msra.mxu1 %v479_v27 }
 0x160   :  { %629 = vrcp.f32 %v309_v30 }
 0x166   :  { %v630_v21 = vpop.eup %629 }
 0x167   :  { %v311_v37 = vmul.f32 %v630_v21, %v309_v30  ;;  %v478_v30 = vld [vmem:[#allocation2 + $0x8] sm:$0xff] }
 0x168   :  { %495 = vmatpush.msra.mxu1 %v478_v30 }
 0x169   :  { %v312_v49 = vsub.f32 2.0, %v311_v37 }
 0x16b   :  { %v313_v38 = vmul.f32 %v630_v21, %v312_v49  ;;  %v477_v49 = vld [vmem:[#allocation2] sm:$0xff] }
 0x16c   :  { %496 = vmatpush.msra.mxu1 %v477_v49 }
 0x16d   :  { %v316_v18 = vmul.f32 %v1006_v58, %v313_v38  ;;  %v315_v59 = vmul.f32 %v1000_v40, %v313_v38  ;;  %v314_v32 = vmul.f32 %v998_v33, %v313_v38  ;;  %v323_v34 = vmul.f32 %v616_v47, %v313_v38  ;;  %548 = vmatmul.msk.f32.vlgmr.msra.gmra.mxu1 %vm79_vm0, %v748_v4 }
 0x16e   :  { %v317_v17 = vmul.f32 %v1010_v48, %v313_v38  ;;  %v318_v40 = vmul.f32 %v1016_v55, %v313_v38  ;;  %v326_v33 = vmul.f32 %v622_v53, %v313_v38  ;;  %v319_v58 = vmul.f32 %v1022_v3, %v313_v38 }
 0x16f   :  { %358 = vperm.xlu0 %596, %v316_v18   ;;  %332 = vst.msk [vmem:[%s1201_s7 + $0x10] sm:$0xff] %vm199_vm1, %v316_v18  ;;  %353 = vperm.xlu2 %595, %v315_v59   ;;  %v320_v48 = vmul.f32 %v1028_v23, %v313_v38  ;;  %v329_v55 = vmul.f32 %v628_v11, %v313_v38 }
 0x170   :  { %331 = vst.msk [vmem:[%s1201_s7 + $0x8] sm:$0xff] %vm199_vm1, %v315_v59  ;;  %348 = vperm.xlu1 %594, %v314_v32   ;;  %v321_v3 = vmul.f32 %v1034_v36, %v313_v38  ;;  %v322_v23 = vmul.f32 %v1040_v50, %v313_v38  ;;  %v324_v47 = vmul.f32 %v618_v60, %v313_v38 }
 0x171   :  { %330 = vst.msk [vmem:[%s1201_s7] sm:$0xff] %vm199_vm1, %v314_v32  ;;  %v325_v36 = vmul.f32 %v620_v62, %v313_v38  ;;  %v327_v50 = vmul.f32 %v624_v56, %v313_v38  ;;  %v328_v26 = vmul.f32 %v626_v1, %v313_v38  ;;  %v475_v1 = vld [vmem:[%s1198_s4 + $0x10] sm:$0xff] }
 0x172   :  { %339 = vst.msk [vmem:[%s1201_s7 + $0x48] sm:$0xff] %vm199_vm1, %v323_v34 }
 0x173   :  { %333 = vst.msk [vmem:[%s1201_s7 + $0x18] sm:$0xff] %vm199_vm1, %v317_v17 }
 0x174   :  { %334 = vst.msk [vmem:[%s1201_s7 + $0x20] sm:$0xff] %vm199_vm1, %v318_v40 }
 0x175   :  { %342 = vst.msk [vmem:[%s1201_s7 + $0x60] sm:$0xff] %vm199_vm1, %v326_v33 }
 0x176   :  { %335 = vst.msk [vmem:[%s1201_s7 + $0x28] sm:$0xff] %vm199_vm1, %v319_v58 }
 0x177   :  { %393 = vperm.xlu0 %596, %v323_v34   ;;  %363 = vperm.xlu2 %595, %v317_v17   ;;  %336 = vst.msk [vmem:[%s1201_s7 + $0x30] sm:$0xff] %vm199_vm1, %v320_v48 }
 0x178   :  { %368 = vperm.xlu1 %594, %v318_v40   ;;  %345 = vst.msk [vmem:[%s1201_s7 + $0x78] sm:$0xff] %vm199_vm1, %v329_v55 }
 0x179   :  { %337 = vst.msk [vmem:[%s1201_s7 + $0x38] sm:$0xff] %vm199_vm1, %v321_v3 }
 0x17a   :  { %338 = vst.msk [vmem:[%s1201_s7 + $0x40] sm:$0xff] %vm199_vm1, %v322_v23 }
 0x17b   :  { %340 = vst.msk [vmem:[%s1201_s7 + $0x50] sm:$0xff] %vm199_vm1, %v324_v47 }
 0x17c   :  { %341 = vst.msk [vmem:[%s1201_s7 + $0x58] sm:$0xff] %vm199_vm1, %v325_v36 }
 0x17d   :  { %343 = vst.msk [vmem:[%s1201_s7 + $0x68] sm:$0xff] %vm199_vm1, %v327_v50 }
 0x17e   :  { %344 = vst.msk [vmem:[%s1201_s7 + $0x70] sm:$0xff] %vm199_vm1, %v328_v26 }
 0x17f   :  { %408 = vperm.xlu0 %596, %v326_v33   ;;  %373 = vperm.xlu2 %595, %v319_v58  }
 0x180   :  { %378 = vperm.xlu1 %594, %v320_v48  }
 0x187   :  { %423 = vperm.xlu0 %596, %v329_v55   ;;  %383 = vperm.xlu2 %595, %v321_v3  }
 0x188   :  { %388 = vperm.xlu1 %594, %v322_v23  }
 0x18f   :  { %398 = vperm.xlu2 %595, %v324_v47  }
 0x190   :  { %403 = vperm.xlu1 %594, %v325_v36  }
 0x197   :  { %413 = vperm.xlu2 %595, %v327_v50  }
 0x198   :  { %418 = vperm.xlu1 %594, %v328_v26  }
 0x1c9   :  { %v354_v0 = vpop.permute.xlu2 %353 }
 0x1ca   :  { %v427_v43 = vmul.f32 %v553_v20, %v354_v0  ;;  %v476_v20 = vld [vmem:[%s1198_s4 + $0x18] sm:$0xff] }
 0x1cb   :  { %516 = vmatpush.msra.mxu2 %v476_v20 }
 0x1cc   :  { %v443_v53 = vsel %vm79_vm0, %v427_v43, 0.0 }
 0x1cd   :  { %517 = vmatpush.msra.mxu2 %v475_v1 }
 0x1d1   :  { %v364_v60 = vpop.permute.xlu2 %363 }
 0x1d2   :  { %v429_v57 = vmul.f32 %v557_v19, %v364_v60  ;;  %v1207_v60 = vunpack.c.h.bf16 %v849_v46 }
 0x1d9   :  { %v374_v51 = vpop.permute.xlu2 %373 }
 0x1da   :  { %v431_v11 = vmul.f32 %v561_v15, %v374_v51 }
 0x1dc   :  { %v451_v38 = vsel %vm79_vm0, %v431_v11, 0.0 }
 0x1e1   :  { %v359_v62 = vpop.permute.xlu0 %358  ;;  %v384_v19 = vpop.permute.xlu2 %383 }
 0x1e2   :  { %v349_v42 = vpop.permute.xlu1 %348  ;;  %v428_v54 = vmul.f32 %v556_v9, %v359_v62  ;;  %v447_v9 = vsel %vm79_vm0, %v429_v57, 0.0  ;;  %v433_v18 = vmul.f32 %v565_v29, %v384_v19 }
 0x1e3   :  { %v426_v44 = vmul.f32 %v552_v10, %v349_v42 }
 0x1e4   :  { %v445_v63 = vsel %vm79_vm0, %v428_v54, 0.0  ;;  %v455_v34 = vsel %vm79_vm0, %v433_v18, 0.0 }
 0x1e5   :  { %v442_v2 = vsel %vm79_vm0, %v426_v44, 0.0 }
 0x1e6   :  { %v444_v61 = vadd.f32 %v443_v53, %v442_v2 }
 0x1e8   :  { %v446_v10 = vadd.f32 %v445_v63, %v444_v61 }
 0x1e9   :  { %v394_v37 = vpop.permute.xlu0 %393 }
 0x1ea   :  { %v369_v56 = vpop.permute.xlu1 %368  ;;  %v448_v12 = vadd.f32 %v447_v9, %v446_v10  ;;  %v435_v17 = vmul.f32 %v569_v41, %v394_v37  ;;  %v498_v46 = vpop.f32.mrf.mxu1 }
 0x1eb   :  { %v430_v7 = vmul.f32 %v560_v8, %v369_v56  ;;  %v474_v8 = vld [vmem:[%s1198_s4 + $0x8] sm:$0xff]  ;;  %s689_s4 = smov [#allocation5]  }
 0x1ec   :  { %518 = vmatpush.msra.mxu2 %v474_v8  ;;  %v459_v48 = vsel %vm79_vm0, %v435_v17, 0.0  ;;  %s531_s3 = sshll.u32 %s689_s4, 4  ;;  %s532_s3 = int_to_ptr.vmem [resolvable:$true] %s531_s3 }
 0x1ed   :  { %v449_v14 = vsel %vm79_vm0, %v430_v7, 0.0 }
 0x1ee   :  { %v450_v22 = vadd.f32 %v449_v14, %v448_v12  ;;  %519 = vmatpush.msra.mxu2 %v473_v16 }
 0x1f0   :  { %v452_v15 = vadd.f32 %v451_v38, %v450_v22 }
 0x1f1   :  { %v409_v25 = vpop.permute.xlu0 %408 }
 0x1f2   :  { %v379_v13 = vpop.permute.xlu1 %378  ;;  %v438_v41 = vmul.f32 %v576_v52, %v409_v25  ;;  %v1208_v52 = vunpack.c.h.bf16 %v844_v45 }
 0x1f3   :  { %v432_v21 = vmul.f32 %v564_v31, %v379_v13  ;;  %v399_v31 = vpop.permute.xlu2 %398 }
 0x1f4   :  { %v436_v4 = vmul.f32 %v572_v39, %v399_v31  ;;  %v465_v0 = vsel %vm79_vm0, %v438_v41, 0.0 }
 0x1f5   :  { %v453_v5 = vsel %vm79_vm0, %v432_v21, 0.0 }
 0x1f6   :  { %v454_v59 = vadd.f32 %v453_v5, %v452_v15  ;;  %v461_v23 = vsel %vm79_vm0, %v436_v4, 0.0 }
 0x1f8   :  { %v456_v33 = vadd.f32 %v455_v34, %v454_v59 }
 0x1f9   :  { %v424_v42 = vpop.permute.xlu0 %423 }
 0x1fa   :  { %v389_v32 = vpop.permute.xlu1 %388  ;;  %v441_v2 = vmul.f32 %v1208_v52, %v424_v42 }
 0x1fb   :  { %v434_v40 = vmul.f32 %v568_v28, %v389_v32  ;;  %v414_v47 = vpop.permute.xlu2 %413 }
 0x1fc   :  { %v439_v39 = vmul.f32 %v1207_v60, %v414_v47  ;;  %v471_v56 = vsel %vm79_vm0, %v441_v2, 0.0 }
 0x1fd   :  { %v457_v58 = vsel %vm79_vm0, %v434_v40, 0.0 }
 0x1fe   :  { %v458_v29 = vadd.f32 %v457_v58, %v456_v33  ;;  %v467_v62 = vsel %vm79_vm0, %v439_v39, 0.0 }
 0x200   :  { %v460_v55 = vadd.f32 %v459_v48, %v458_v29 }
 0x202   :  { %v404_v3 = vpop.permute.xlu1 %403  ;;  %v462_v36 = vadd.f32 %v461_v23, %v460_v55 }
 0x203   :  { %v437_v28 = vmul.f32 %v1206_v24, %v404_v3 }
 0x205   :  { %v463_v50 = vsel %vm79_vm0, %v437_v28, 0.0 }
 0x206   :  { %v464_v26 = vadd.f32 %v463_v50, %v462_v36 }
 0x208   :  { %v466_v43 = vadd.f32 %v465_v0, %v464_v26 }
 0x20a   :  { %v419_v44 = vpop.permute.xlu1 %418  ;;  %v468_v53 = vadd.f32 %v467_v62, %v466_v43 }
 0x20b   :  { %v440_v51 = vmul.f32 %v1209_v35, %v419_v44 }
 0x20d   :  { %v469_v54 = vsel %vm79_vm0, %v440_v51, 0.0 }
 0x20e   :  { %v470_v61 = vadd.f32 %v469_v54, %v468_v53 }
 0x210   :  { %v472_v57 = vadd.f32 %v471_v56, %v470_v61 }
 0x212   :  { %549 = vmatmul.msk.f32.vlgmr.msra.gmra.mxu2 %vm79_vm0, %v472_v57 }
 0x295   :  { %v521_v63 = vpop.f32.mrf.mxu2 }
 0x296   :  { %v522_v7 = vadd.f32 %v521_v63, %v498_v46 }
 0x298   :  { %631 = vtanh.f32 %v522_v7 }
 0x29e   :  { %v632_v45 = vpop.eup %631 }
 0x29f   :  { %525 = vst [vmem:[#allocation5] sm:$0xff] %v632_v45 }
 0x2a0   :  { %536 = dma.vmem_to_hbm [thread:$0]  %s532_s3, 128, %s534_s22, [#allocation4]  }
 0x2a1   :  { %683 = dma.done.wait [#allocation4], 128  }
 0x2a2   :  { %684 = vsyncadd [#allocation4], 4294967168 }
 0x2a3   :  { %545 = vsyncpa [#allocation3], 1 }
 0x2a4   :  { %546 = vsyncpa [#allocation4], 1 }

</bundles_post_ra>
